<compile_context>
chip_gen: v5e
topology: v5e:2x2
jax: 0.10.0
libtpu: 0.0.40
codegen_flags: <defaults>
</compile_context>

<pallas_src>
import functools

import jax
import jax.numpy as jnp
from jax import lax
from jax.experimental import pallas as pl
from jax.experimental.pallas import tpu as pltpu


# ---------------- config (mirrors RGBExtractor.__init__) ----------------
W_CEIL = 32            # w_ceil
W_PARAM = 32.0         # w
WINDOW = 4
K = int(W_PARAM // WINDOW)   # length of the learned softmax window (= 8)
PAD = K // 2


# ---------------- filter construction (plain-JAX glue) ----------------
def build_rgb_filter(r, g, b):
    """Equivalent of RGBExtractor.get_RGB_filter().

    torch.conv1d(delta_at_p, softmax_window, padding=K//2) is just the
    reversed softmax window re-centred at p, so we gather it directly.
    Returns RGB_sx of shape (3, w_ceil) (the trailing 1x1 dims dropped).
    NOTE: the "drop last column" shortcut assumes K is even (K=8 here).
    """
    peaks = jnp.array([int(round(W_PARAM / 4)),
                       int(round(W_PARAM / 2)),
                       int(round(3 * W_PARAM / 4))], dtype=jnp.int32)
    sx = jax.nn.softmax(jnp.stack([r, g, b], axis=0), axis=-1)      # (3, K)
    i = jnp.arange(W_CEIL)[None, :]                                 # (1, w_ceil)
    idx = peaks[:, None] + PAD - i                                  # (3, w_ceil)
    valid = (idx >= 0) & (idx < K)
    gathered = jnp.take_along_axis(sx, jnp.clip(idx, 0, K - 1), axis=1)
    return jnp.where(valid, gathered, 0.0).astype(jnp.float32)      # (3, w_ceil)


# ---------------- fused forward kernel ----------------
def _fused_kernel(filt_smem_ref, filt_ref, x_ref, z_ref, y_ref, img_ref, *,
                  bn, wz, wc_eff):
    # filt_smem_ref : (3, wc)       SMEM   scalar taps for the width conv
    # filt_ref      : (3, C)        VMEM   MXU lhs for the 1x1 conv (C == wc)
    # x_ref         : (BN, C, HWx)  VMEM
    # z_ref         : (BN, HWz)     VMEM   (batch on sublanes, lane-dense HWz)
    # y_ref         : (BN, 3, HWx)  VMEM out (lane-dense)
    # img_ref       : (3, BN, HWz)  VMEM out (channel-major, lane-dense)
    filt = filt_ref[...]                                            # (3, C)

    # ---- y: 1x1 conv over channels, (3, C) @ (C, HWx) per element (MXU) ----
    def y_body(b, carry):
        y_ref[b] = jnp.dot(filt, x_ref[b], preferred_element_type=jnp.float32)
        return carry
    lax.fori_loop(0, bn, y_body, 0, unroll=min(4, bn))

    # ---- rgb_filter_image: causal width conv over the whole BN slab ----
    # img[c, b, p] = sum_m filt[c, m] * z[b, p - m]   (only within-row, w >= m)
    # Taps m >= wz never contribute (mask all-false) and are skipped
    # statically via wc_eff = min(wc, wz).  The per-row roll wraps only to
    # positions with w < m, which the per-tap select zeroes out, so no
    # explicit padding of z is needed.
    z_slab = z_ref[...]                                             # (BN, HWz)
    w_idx = lax.broadcasted_iota(jnp.int32, z_slab.shape, 1) % wz   # in-row col
    acc = [z_slab * filt_smem_ref[c, 0] for c in range(3)]          # tap m = 0
    for m in range(1, wc_eff):
        shifted = jnp.where(w_idx >= m, pltpu.roll(z_slab, m, axis=1), 0.0)
        for c in range(3):
            acc[c] = acc[c] + filt_smem_ref[c, m] * shifted
    for c in range(3):
        img_ref[c] = acc[c]                                         # wide slab store


# ---------------- block-size / topology heuristics ----------------
def _tpu_topology():
    """(tensorcores per chip, VMEM block budget, scoped-VMEM limit)."""
    kind = ""
    try:
        kind = jax.devices()[0].device_kind.lower()
    except Exception:
        pass
    if "v7" in kind or "7x" in kind:
        # v7x: 2 TCs per chip, 64 MiB physical VMEM per TC.
        return 2, 36 * 1024 * 1024, 56 * 1024 * 1024
    if "v4" in kind or "v5p" in kind:
        # Megacore parts: 2 TCs, 128 MiB physical VMEM.
        return 2, 72 * 1024 * 1024, 100 * 1024 * 1024
    # v5e / v6e: single TensorCore, 128 MiB physical VMEM.
    return 1, 72 * 1024 * 1024, 100 * 1024 * 1024


def _choose_batch_block(n, c, hw_x, hw_z, num_cores, budget_bytes):
    """Batch elements per grid step.

    bn appears as the second-to-last dim of the z / img blocks, so it must
    equal n (full dim) or be a multiple of 8 that divides n.  Pick the largest
    such bn whose double-buffered in/out tiles fit the VMEM budget; keep
    >= 2 grid steps only when the chip actually has 2 TensorCores.
    """
    per_elem = 4 * ((c + 3) * hw_x + 4 * hw_z)        # x + y + z + img bytes
    bn_cap = max(1, budget_bytes // (2 * per_elem))   # 2x: double-buffered
    valid = sorted({n} | {b for b in range(8, n, 8) if n % b == 0})
    if num_cores >= 2:
        split = [b for b in valid if b <= n // 2 and b <= bn_cap]
        if split:
            return max(split)
    fit = [b for b in valid if b <= bn_cap]
    return max(fit) if fit else min(valid)


# ---------------- full forward ----------------
def rgb_extractor_forward(params, x_exp, z):
    rgb_sx = build_rgb_filter(*params)               # (3, w_ceil)
    n, c, h, w = x_exp.shape
    nz, cz, hz, wz = z.shape
    assert nz == n and cz == 1
    wc = rgb_sx.shape[-1]
    # torch.conv2d(x_exp, RGB_sx) contracts x_exp's channel dim against the
    # (3, w_ceil, 1, 1) filter, so the channel count must equal w_ceil.
    assert c == wc, "x_exp channel count must equal w_ceil"

    hw_x = h * w
    hw_z = hz * wz
    wc_eff = min(wc, wz)                             # taps m >= wz are zero

    x_flat = x_exp.reshape(n, c, hw_x)               # free reshape (contiguous)
    z_flat = z.reshape(n, hw_z)                      # free reshape (contiguous)

    num_cores, budget, vmem_limit = _tpu_topology()
    bn = _choose_batch_block(n, c, hw_x, hw_z, num_cores, budget)
    grid = (n // bn,)

    kernel = functools.partial(_fused_kernel, bn=bn, wz=wz, wc_eff=wc_eff)

    y_flat, img_flat = pl.pallas_call(
        kernel,
        out_shape=(
            jax.ShapeDtypeStruct((n, 3, hw_x), jnp.float32),
            jax.ShapeDtypeStruct((3, n, hw_z), jnp.float32),
        ),
        grid=grid,
        in_specs=[
            pl.BlockSpec(memory_space=pltpu.MemorySpace.SMEM),    # filter taps (scalars)
            pl.BlockSpec((3, c), lambda i: (0, 0)),               # filter (VMEM, MXU lhs)
            pl.BlockSpec((bn, c, hw_x), lambda i: (i, 0, 0)),     # x
            pl.BlockSpec((bn, hw_z), lambda i: (i, 0)),           # z (lane-dense)
        ],
        out_specs=(
            pl.BlockSpec((bn, 3, hw_x), lambda i: (i, 0, 0)),     # y (lane-dense)
            pl.BlockSpec((3, bn, hw_z), lambda i: (0, i, 0)),     # img (chan-major)
        ),
        compiler_params=pltpu.CompilerParams(
            dimension_semantics=("parallel",),
            vmem_limit_bytes=vmem_limit,
        ),
    )(rgb_sx, rgb_sx, x_flat, z_flat)

    y = y_flat.reshape(n, 3, h, w)
    rgb_filter_image = jnp.transpose(img_flat, (1, 0, 2)).reshape(n, 3, hz, wz)
    return y, rgb_filter_image


if __name__ == "__main__":
    key = jax.random.PRNGKey(0)
    k1, k2, k3, k4, k5 = jax.random.split(key, 5)

    # Parameters R, G, B have shape (1, 1, K) in the module; flattened to (K,).
    # (Module init is zeros; small deterministic random values make the
    #  softmax non-trivial.)
    r = 0.1 * jax.random.normal(k1, (K,), jnp.float32)
    g = 0.1 * jax.random.normal(k2, (K,), jnp.float32)
    b = 0.1 * jax.random.normal(k3, (K,), jnp.float32)

    N, H, W_IMG = 2, 8, 16
    x_exp = jax.random.normal(k4, (N, W_CEIL, H, W_IMG), jnp.float32)   # NCHW
    z = jax.random.normal(k5, (N, 1, H, W_IMG), jnp.float32)            # NCHW

    y, rgb_img = rgb_extractor_forward((r, g, b), x_exp, z)
    jax.block_until_ready((y, rgb_img))

    # Sanity check against plain-XLA convolutions (same math as torch.conv2d).
    rgb_sx = build_rgb_filter(r, g, b)
    w1 = rgb_sx[:, :, None, None]                    # (3, w_ceil, 1, 1) OIHW
    y_ref = lax.conv_general_dilated(
        x_exp, w1, (1, 1), "VALID",
        dimension_numbers=("NCHW", "OIHW", "NCHW"))
    w2 = rgb_sx[:, ::-1][:, None, None, :]           # flipped, (3, 1, 1, w_ceil)
    img_ref = lax.conv_general_dilated(
        z, w2, (1, 1), ((0, 0), (W_CEIL - 1, W_CEIL - 1)),
        dimension_numbers=("NCHW", "OIHW", "NCHW"))[..., :W_IMG]

    assert y.shape == (N, 3, H, W_IMG) and rgb_img.shape == (N, 3, H, W_IMG)
    assert jnp.allclose(y, y_ref, atol=1e-4, rtol=1e-4)
    assert jnp.allclose(rgb_img, img_ref, atol=1e-4, rtol=1e-4)
    print("KERNEL_OK")
</pallas_src>

<mosaic_0001>
module attributes {stable_mosaic.version = 11 : i64} {
  func.func @_fused_kernel(%arg0: i32, %arg1: memref<3x32xf32, #tpu.memory_space<smem>>, %arg2: memref<3x32xf32, #tpu.memory_space<vmem>>, %arg3: memref<2x32x128xf32, #tpu.memory_space<vmem>>, %arg4: memref<2x128xf32, #tpu.memory_space<vmem>>, %arg5: memref<2x3x128xf32, #tpu.memory_space<vmem>>, %arg6: memref<3x2x128xf32, #tpu.memory_space<vmem>>) attributes {dimension_semantics = [#tpu.dimension_semantics<parallel>], iteration_bounds = array<i64: 1>, scalar_prefetch = 0 : i64, scratch_operands = 0 : i64, tpu.core_type = #tpu.core_type<tc>, window_params = [{transform_indices = @transform_0, window_bounds = array<i64: 3, 32>}, {pipeline_mode = #tpu.pipeline_mode<synchronous>, transform_indices = @transform_1, window_bounds = array<i64: 3, 32>}, {transform_indices = @transform_2, window_bounds = array<i64: 2, 32, 128>}, {transform_indices = @transform_3, window_bounds = array<i64: 2, 128>}, {transform_indices = @transform_4, window_bounds = array<i64: 2, 3, 128>}, {transform_indices = @transform_5, window_bounds = array<i64: 3, 2, 128>}]} {
    %c0 = arith.constant 0 : index
    %c0_0 = arith.constant 0 : index
    %0 = vector.load %arg2[%c0, %c0_0] : memref<3x32xf32, #tpu.memory_space<vmem>>, vector<3x32xf32>
    %c0_i32 = arith.constant 0 : i32
    %1 = arith.index_cast %c0_i32 : i32 to index
    %c0_1 = arith.constant 0 : index
    %c0_2 = arith.constant 0 : index
    %2 = vector.load %arg3[%1, %c0_1, %c0_2] : memref<2x32x128xf32, #tpu.memory_space<vmem>>, vector<1x32x128xf32>
    %3 = vector.shape_cast %2 : vector<1x32x128xf32> to vector<32x128xf32>
    %cst = arith.constant dense<0.000000e+00> : vector<3x128xf32>
    %4 = tpu.matmul %0, %3, %cst {dimension_numbers = #tpu.dot_dimension_numbers<[1], [0], [0], [1], [0, 0, 1, 1], [], []>} : vector<3x32xf32>, vector<32x128xf32>, vector<3x128xf32> -> vector<3x128xf32>
    %5 = arith.index_cast %c0_i32 : i32 to index
    %c0_3 = arith.constant 0 : index
    %c0_4 = arith.constant 0 : index
    %6 = vector.load %arg5[%5, %c0_3, %c0_4] : memref<2x3x128xf32, #tpu.memory_space<vmem>>, vector<1x3x128xf32>
    %7 = vector.shape_cast %6 : vector<1x3x128xf32> to vector<3x128xf32>
    %8 = vector.shape_cast %4 : vector<3x128xf32> to vector<1x3x128xf32>
    tpu.vector_store %arg5[%5, %c0_3, %c0_4], %8 {strides = array<i32>} : memref<2x3x128xf32, #tpu.memory_space<vmem>>, vector<1x3x128xf32>,
    %c1_i32 = arith.constant 1 : i32
    %9 = arith.index_cast %c1_i32 : i32 to index
    %c0_5 = arith.constant 0 : index
    %c0_6 = arith.constant 0 : index
    %10 = vector.load %arg3[%9, %c0_5, %c0_6] : memref<2x32x128xf32, #tpu.memory_space<vmem>>, vector<1x32x128xf32>
    %11 = vector.shape_cast %10 : vector<1x32x128xf32> to vector<32x128xf32>
    %cst_7 = arith.constant dense<0.000000e+00> : vector<3x128xf32>
    %12 = tpu.matmul %0, %11, %cst_7 {dimension_numbers = #tpu.dot_dimension_numbers<[1], [0], [0], [1], [0, 0, 1, 1], [], []>} : vector<3x32xf32>, vector<32x128xf32>, vector<3x128xf32> -> vector<3x128xf32>
    %13 = arith.index_cast %c1_i32 : i32 to index
    %c0_8 = arith.constant 0 : index
    %c0_9 = arith.constant 0 : index
    %14 = vector.load %arg5[%13, %c0_8, %c0_9] : memref<2x3x128xf32, #tpu.memory_space<vmem>>, vector<1x3x128xf32>
    %15 = vector.shape_cast %14 : vector<1x3x128xf32> to vector<3x128xf32>
    %16 = vector.shape_cast %12 : vector<3x128xf32> to vector<1x3x128xf32>
    tpu.vector_store %arg5[%13, %c0_8, %c0_9], %16 {strides = array<i32>} : memref<2x3x128xf32, #tpu.memory_space<vmem>>, vector<1x3x128xf32>,
    %c2_i32 = arith.constant 2 : i32
    %c0_10 = arith.constant 0 : index
    %c0_11 = arith.constant 0 : index
    %17 = vector.load %arg4[%c0_10, %c0_11] : memref<2x128xf32, #tpu.memory_space<vmem>>, vector<2x128xf32>
    %18 = tpu.iota {dimensions = array<i32: 1>} : vector<2x128xi32>
    %c16_i32 = arith.constant 16 : i32
    %c0_i32_12 = arith.constant 0 : i32
    %19 = arith.cmpi eq, %c16_i32, %c0_i32_12 : i32
    %c1_i32_13 = arith.constant 1 : i32
    %20 = arith.select %19, %c1_i32_13, %c16_i32 : i32
    %21 = vector.broadcast %20 : i32 to vector<2x128xi32>
    %22 = arith.remsi %18, %21 : vector<2x128xi32>
    %c0_i32_14 = arith.constant 0 : i32
    %23 = vector.broadcast %c0_i32_14 : i32 to vector<2x128xi32>
    %24 = arith.cmpi ne, %22, %23 : vector<2x128xi32>
    %c0_i32_15 = arith.constant 0 : i32
    %25 = vector.broadcast %c0_i32_15 : i32 to vector<2x128xi32>
    %26 = arith.cmpi slt, %22, %25 : vector<2x128xi32>
    %c0_i32_16 = arith.constant 0 : i32
    %27 = arith.cmpi slt, %20, %c0_i32_16 : i32
    %28 = vector.broadcast %27 : i1 to vector<2x128xi1>
    %29 = vector.broadcast %28 : vector<2x128xi1> to vector<2x128xi1>
    %30 = arith.xori %26, %29 : vector<2x128xi1>
    %31 = arith.andi %30, %24 : vector<2x128xi1>
    %32 = vector.broadcast %20 : i32 to vector<2x128xi32>
    %33 = arith.addi %22, %32 : vector<2x128xi32>
    %34 = arith.select %31, %33, %22 : vector<2x128xi1>, vector<2x128xi32>
    %c0_17 = arith.constant 0 : index
    %c0_18 = arith.constant 0 : index
    %35 = memref.load %arg1[%c0_17, %c0_18] : memref<3x32xf32, #tpu.memory_space<smem>>
    %36 = vector.broadcast %35 : f32 to vector<2x128xf32>
    %37 = arith.mulf %17, %36 : vector<2x128xf32>
    %c1 = arith.constant 1 : index
    %c0_19 = arith.constant 0 : index
    %38 = memref.load %arg1[%c1, %c0_19] : memref<3x32xf32, #tpu.memory_space<smem>>
    %39 = vector.broadcast %38 : f32 to vector<2x128xf32>
    %40 = arith.mulf %17, %39 : vector<2x128xf32>
    %c2 = arith.constant 2 : index
    %c0_20 = arith.constant 0 : index
    %41 = memref.load %arg1[%c2, %c0_20] : memref<3x32xf32, #tpu.memory_space<smem>>
    %42 = vector.broadcast %41 : f32 to vector<2x128xf32>
    %43 = arith.mulf %17, %42 : vector<2x128xf32>
    %c1_i32_21 = arith.constant 1 : i32
    %44 = vector.broadcast %c1_i32_21 : i32 to vector<2x128xi32>
    %45 = arith.cmpi sge, %34, %44 : vector<2x128xi32>
    %c1_i32_22 = arith.constant 1 : i32
    %46 = tpu.dynamic_rotate %17 by %c1_i32_22 dim 1 : vector<2x128xf32>, i32 -> vector<2x128xf32>
    %cst_23 = arith.constant 0.000000e+00 : f32
    %47 = vector.broadcast %cst_23 : f32 to vector<2x128xf32>
    %48 = arith.select %45, %46, %47 : vector<2x128xi1>, vector<2x128xf32>
    %c0_24 = arith.constant 0 : index
    %c1_25 = arith.constant 1 : index
    %49 = memref.load %arg1[%c0_24, %c1_25] : memref<3x32xf32, #tpu.memory_space<smem>>
    %50 = vector.broadcast %49 : f32 to vector<2x128xf32>
    %51 = arith.mulf %50, %48 : vector<2x128xf32>
    %52 = arith.addf %37, %51 : vector<2x128xf32>
    %c1_26 = arith.constant 1 : index
    %c1_27 = arith.constant 1 : index
    %53 = memref.load %arg1[%c1_26, %c1_27] : memref<3x32xf32, #tpu.memory_space<smem>>
    %54 = vector.broadcast %53 : f32 to vector<2x128xf32>
    %55 = arith.mulf %54, %48 : vector<2x128xf32>
    %56 = arith.addf %40, %55 : vector<2x128xf32>
    %c2_28 = arith.constant 2 : index
    %c1_29 = arith.constant 1 : index
    %57 = memref.load %arg1[%c2_28, %c1_29] : memref<3x32xf32, #tpu.memory_space<smem>>
    %58 = vector.broadcast %57 : f32 to vector<2x128xf32>
    %59 = arith.mulf %58, %48 : vector<2x128xf32>
    %60 = arith.addf %43, %59 : vector<2x128xf32>
    %c2_i32_30 = arith.constant 2 : i32
    %61 = vector.broadcast %c2_i32_30 : i32 to vector<2x128xi32>
    %62 = arith.cmpi sge, %34, %61 : vector<2x128xi32>
    %c2_i32_31 = arith.constant 2 : i32
    %63 = tpu.dynamic_rotate %17 by %c2_i32_31 dim 1 : vector<2x128xf32>, i32 -> vector<2x128xf32>
    %cst_32 = arith.constant 0.000000e+00 : f32
    %64 = vector.broadcast %cst_32 : f32 to vector<2x128xf32>
    %65 = arith.select %62, %63, %64 : vector<2x128xi1>, vector<2x128xf32>
    %c0_33 = arith.constant 0 : index
    %c2_34 = arith.constant 2 : index
    %66 = memref.load %arg1[%c0_33, %c2_34] : memref<3x32xf32, #tpu.memory_space<smem>>
    %67 = vector.broadcast %66 : f32 to vector<2x128xf32>
    %68 = arith.mulf %67, %65 : vector<2x128xf32>
    %69 = arith.addf %52, %68 : vector<2x128xf32>
    %c1_35 = arith.constant 1 : index
    %c2_36 = arith.constant 2 : index
    %70 = memref.load %arg1[%c1_35, %c2_36] : memref<3x32xf32, #tpu.memory_space<smem>>
    %71 = vector.broadcast %70 : f32 to vector<2x128xf32>
    %72 = arith.mulf %71, %65 : vector<2x128xf32>
    %73 = arith.addf %56, %72 : vector<2x128xf32>
    %c2_37 = arith.constant 2 : index
    %c2_38 = arith.constant 2 : index
    %74 = memref.load %arg1[%c2_37, %c2_38] : memref<3x32xf32, #tpu.memory_space<smem>>
    %75 = vector.broadcast %74 : f32 to vector<2x128xf32>
    %76 = arith.mulf %75, %65 : vector<2x128xf32>
    %77 = arith.addf %60, %76 : vector<2x128xf32>
    %c3_i32 = arith.constant 3 : i32
    %78 = vector.broadcast %c3_i32 : i32 to vector<2x128xi32>
    %79 = arith.cmpi sge, %34, %78 : vector<2x128xi32>
    %c3_i32_39 = arith.constant 3 : i32
    %80 = tpu.dynamic_rotate %17 by %c3_i32_39 dim 1 : vector<2x128xf32>, i32 -> vector<2x128xf32>
    %cst_40 = arith.constant 0.000000e+00 : f32
    %81 = vector.broadcast %cst_40 : f32 to vector<2x128xf32>
    %82 = arith.select %79, %80, %81 : vector<2x128xi1>, vector<2x128xf32>
    %c0_41 = arith.constant 0 : index
    %c3 = arith.constant 3 : index
    %83 = memref.load %arg1[%c0_41, %c3] : memref<3x32xf32, #tpu.memory_space<smem>>
    %84 = vector.broadcast %83 : f32 to vector<2x128xf32>
    %85 = arith.mulf %84, %82 : vector<2x128xf32>
    %86 = arith.addf %69, %85 : vector<2x128xf32>
    %c1_42 = arith.constant 1 : index
    %c3_43 = arith.constant 3 : index
    %87 = memref.load %arg1[%c1_42, %c3_43] : memref<3x32xf32, #tpu.memory_space<smem>>
    %88 = vector.broadcast %87 : f32 to vector<2x128xf32>
    %89 = arith.mulf %88, %82 : vector<2x128xf32>
    %90 = arith.addf %73, %89 : vector<2x128xf32>
    %c2_44 = arith.constant 2 : index
    %c3_45 = arith.constant 3 : index
    %91 = memref.load %arg1[%c2_44, %c3_45] : memref<3x32xf32, #tpu.memory_space<smem>>
    %92 = vector.broadcast %91 : f32 to vector<2x128xf32>
    %93 = arith.mulf %92, %82 : vector<2x128xf32>
    %94 = arith.addf %77, %93 : vector<2x128xf32>
    %c4_i32 = arith.constant 4 : i32
    %95 = vector.broadcast %c4_i32 : i32 to vector<2x128xi32>
    %96 = arith.cmpi sge, %34, %95 : vector<2x128xi32>
    %c4_i32_46 = arith.constant 4 : i32
    %97 = tpu.dynamic_rotate %17 by %c4_i32_46 dim 1 : vector<2x128xf32>, i32 -> vector<2x128xf32>
    %cst_47 = arith.constant 0.000000e+00 : f32
    %98 = vector.broadcast %cst_47 : f32 to vector<2x128xf32>
    %99 = arith.select %96, %97, %98 : vector<2x128xi1>, vector<2x128xf32>
    %c0_48 = arith.constant 0 : index
    %c4 = arith.constant 4 : index
    %100 = memref.load %arg1[%c0_48, %c4] : memref<3x32xf32, #tpu.memory_space<smem>>
    %101 = vector.broadcast %100 : f32 to vector<2x128xf32>
    %102 = arith.mulf %101, %99 : vector<2x128xf32>
    %103 = arith.addf %86, %102 : vector<2x128xf32>
    %c1_49 = arith.constant 1 : index
    %c4_50 = arith.constant 4 : index
    %104 = memref.load %arg1[%c1_49, %c4_50] : memref<3x32xf32, #tpu.memory_space<smem>>
    %105 = vector.broadcast %104 : f32 to vector<2x128xf32>
    %106 = arith.mulf %105, %99 : vector<2x128xf32>
    %107 = arith.addf %90, %106 : vector<2x128xf32>
    %c2_51 = arith.constant 2 : index
    %c4_52 = arith.constant 4 : index
    %108 = memref.load %arg1[%c2_51, %c4_52] : memref<3x32xf32, #tpu.memory_space<smem>>
    %109 = vector.broadcast %108 : f32 to vector<2x128xf32>
    %110 = arith.mulf %109, %99 : vector<2x128xf32>
    %111 = arith.addf %94, %110 : vector<2x128xf32>
    %c5_i32 = arith.constant 5 : i32
    %112 = vector.broadcast %c5_i32 : i32 to vector<2x128xi32>
    %113 = arith.cmpi sge, %34, %112 : vector<2x128xi32>
    %c5_i32_53 = arith.constant 5 : i32
    %114 = tpu.dynamic_rotate %17 by %c5_i32_53 dim 1 : vector<2x128xf32>, i32 -> vector<2x128xf32>
    %cst_54 = arith.constant 0.000000e+00 : f32
    %115 = vector.broadcast %cst_54 : f32 to vector<2x128xf32>
    %116 = arith.select %113, %114, %115 : vector<2x128xi1>, vector<2x128xf32>
    %c0_55 = arith.constant 0 : index
    %c5 = arith.constant 5 : index
    %117 = memref.load %arg1[%c0_55, %c5] : memref<3x32xf32, #tpu.memory_space<smem>>
    %118 = vector.broadcast %117 : f32 to vector<2x128xf32>
    %119 = arith.mulf %118, %116 : vector<2x128xf32>
    %120 = arith.addf %103, %119 : vector<2x128xf32>
    %c1_56 = arith.constant 1 : index
    %c5_57 = arith.constant 5 : index
    %121 = memref.load %arg1[%c1_56, %c5_57] : memref<3x32xf32, #tpu.memory_space<smem>>
    %122 = vector.broadcast %121 : f32 to vector<2x128xf32>
    %123 = arith.mulf %122, %116 : vector<2x128xf32>
    %124 = arith.addf %107, %123 : vector<2x128xf32>
    %c2_58 = arith.constant 2 : index
    %c5_59 = arith.constant 5 : index
    %125 = memref.load %arg1[%c2_58, %c5_59] : memref<3x32xf32, #tpu.memory_space<smem>>
    %126 = vector.broadcast %125 : f32 to vector<2x128xf32>
    %127 = arith.mulf %126, %116 : vector<2x128xf32>
    %128 = arith.addf %111, %127 : vector<2x128xf32>
    %c6_i32 = arith.constant 6 : i32
    %129 = vector.broadcast %c6_i32 : i32 to vector<2x128xi32>
    %130 = arith.cmpi sge, %34, %129 : vector<2x128xi32>
    %c6_i32_60 = arith.constant 6 : i32
    %131 = tpu.dynamic_rotate %17 by %c6_i32_60 dim 1 : vector<2x128xf32>, i32 -> vector<2x128xf32>
    %cst_61 = arith.constant 0.000000e+00 : f32
    %132 = vector.broadcast %cst_61 : f32 to vector<2x128xf32>
    %133 = arith.select %130, %131, %132 : vector<2x128xi1>, vector<2x128xf32>
    %c0_62 = arith.constant 0 : index
    %c6 = arith.constant 6 : index
    %134 = memref.load %arg1[%c0_62, %c6] : memref<3x32xf32, #tpu.memory_space<smem>>
    %135 = vector.broadcast %134 : f32 to vector<2x128xf32>
    %136 = arith.mulf %135, %133 : vector<2x128xf32>
    %137 = arith.addf %120, %136 : vector<2x128xf32>
    %c1_63 = arith.constant 1 : index
    %c6_64 = arith.constant 6 : index
    %138 = memref.load %arg1[%c1_63, %c6_64] : memref<3x32xf32, #tpu.memory_space<smem>>
    %139 = vector.broadcast %138 : f32 to vector<2x128xf32>
    %140 = arith.mulf %139, %133 : vector<2x128xf32>
    %141 = arith.addf %124, %140 : vector<2x128xf32>
    %c2_65 = arith.constant 2 : index
    %c6_66 = arith.constant 6 : index
    %142 = memref.load %arg1[%c2_65, %c6_66] : memref<3x32xf32, #tpu.memory_space<smem>>
    %143 = vector.broadcast %142 : f32 to vector<2x128xf32>
    %144 = arith.mulf %143, %133 : vector<2x128xf32>
    %145 = arith.addf %128, %144 : vector<2x128xf32>
    %c7_i32 = arith.constant 7 : i32
    %146 = vector.broadcast %c7_i32 : i32 to vector<2x128xi32>
    %147 = arith.cmpi sge, %34, %146 : vector<2x128xi32>
    %c7_i32_67 = arith.constant 7 : i32
    %148 = tpu.dynamic_rotate %17 by %c7_i32_67 dim 1 : vector<2x128xf32>, i32 -> vector<2x128xf32>
    %cst_68 = arith.constant 0.000000e+00 : f32
    %149 = vector.broadcast %cst_68 : f32 to vector<2x128xf32>
    %150 = arith.select %147, %148, %149 : vector<2x128xi1>, vector<2x128xf32>
    %c0_69 = arith.constant 0 : index
    %c7 = arith.constant 7 : index
    %151 = memref.load %arg1[%c0_69, %c7] : memref<3x32xf32, #tpu.memory_space<smem>>
    %152 = vector.broadcast %151 : f32 to vector<2x128xf32>
    %153 = arith.mulf %152, %150 : vector<2x128xf32>
    %154 = arith.addf %137, %153 : vector<2x128xf32>
    %c1_70 = arith.constant 1 : index
    %c7_71 = arith.constant 7 : index
    %155 = memref.load %arg1[%c1_70, %c7_71] : memref<3x32xf32, #tpu.memory_space<smem>>
    %156 = vector.broadcast %155 : f32 to vector<2x128xf32>
    %157 = arith.mulf %156, %150 : vector<2x128xf32>
    %158 = arith.addf %141, %157 : vector<2x128xf32>
    %c2_72 = arith.constant 2 : index
    %c7_73 = arith.constant 7 : index
    %159 = memref.load %arg1[%c2_72, %c7_73] : memref<3x32xf32, #tpu.memory_space<smem>>
    %160 = vector.broadcast %159 : f32 to vector<2x128xf32>
    %161 = arith.mulf %160, %150 : vector<2x128xf32>
    %162 = arith.addf %145, %161 : vector<2x128xf32>
    %c8_i32 = arith.constant 8 : i32
    %163 = vector.broadcast %c8_i32 : i32 to vector<2x128xi32>
    %164 = arith.cmpi sge, %34, %163 : vector<2x128xi32>
    %c8_i32_74 = arith.constant 8 : i32
    %165 = tpu.dynamic_rotate %17 by %c8_i32_74 dim 1 : vector<2x128xf32>, i32 -> vector<2x128xf32>
    %cst_75 = arith.constant 0.000000e+00 : f32
    %166 = vector.broadcast %cst_75 : f32 to vector<2x128xf32>
    %167 = arith.select %164, %165, %166 : vector<2x128xi1>, vector<2x128xf32>
    %c0_76 = arith.constant 0 : index
    %c8 = arith.constant 8 : index
    %168 = memref.load %arg1[%c0_76, %c8] : memref<3x32xf32, #tpu.memory_space<smem>>
    %169 = vector.broadcast %168 : f32 to vector<2x128xf32>
    %170 = arith.mulf %169, %167 : vector<2x128xf32>
    %171 = arith.addf %154, %170 : vector<2x128xf32>
    %c1_77 = arith.constant 1 : index
    %c8_78 = arith.constant 8 : index
    %172 = memref.load %arg1[%c1_77, %c8_78] : memref<3x32xf32, #tpu.memory_space<smem>>
    %173 = vector.broadcast %172 : f32 to vector<2x128xf32>
    %174 = arith.mulf %173, %167 : vector<2x128xf32>
    %175 = arith.addf %158, %174 : vector<2x128xf32>
    %c2_79 = arith.constant 2 : index
    %c8_80 = arith.constant 8 : index
    %176 = memref.load %arg1[%c2_79, %c8_80] : memref<3x32xf32, #tpu.memory_space<smem>>
    %177 = vector.broadcast %176 : f32 to vector<2x128xf32>
    %178 = arith.mulf %177, %167 : vector<2x128xf32>
    %179 = arith.addf %162, %178 : vector<2x128xf32>
    %c9_i32 = arith.constant 9 : i32
    %180 = vector.broadcast %c9_i32 : i32 to vector<2x128xi32>
    %181 = arith.cmpi sge, %34, %180 : vector<2x128xi32>
    %c9_i32_81 = arith.constant 9 : i32
    %182 = tpu.dynamic_rotate %17 by %c9_i32_81 dim 1 : vector<2x128xf32>, i32 -> vector<2x128xf32>
    %cst_82 = arith.constant 0.000000e+00 : f32
    %183 = vector.broadcast %cst_82 : f32 to vector<2x128xf32>
    %184 = arith.select %181, %182, %183 : vector<2x128xi1>, vector<2x128xf32>
    %c0_83 = arith.constant 0 : index
    %c9 = arith.constant 9 : index
    %185 = memref.load %arg1[%c0_83, %c9] : memref<3x32xf32, #tpu.memory_space<smem>>
    %186 = vector.broadcast %185 : f32 to vector<2x128xf32>
    %187 = arith.mulf %186, %184 : vector<2x128xf32>
    %188 = arith.addf %171, %187 : vector<2x128xf32>
    %c1_84 = arith.constant 1 : index
    %c9_85 = arith.constant 9 : index
    %189 = memref.load %arg1[%c1_84, %c9_85] : memref<3x32xf32, #tpu.memory_space<smem>>
    %190 = vector.broadcast %189 : f32 to vector<2x128xf32>
    %191 = arith.mulf %190, %184 : vector<2x128xf32>
    %192 = arith.addf %175, %191 : vector<2x128xf32>
    %c2_86 = arith.constant 2 : index
    %c9_87 = arith.constant 9 : index
    %193 = memref.load %arg1[%c2_86, %c9_87] : memref<3x32xf32, #tpu.memory_space<smem>>
    %194 = vector.broadcast %193 : f32 to vector<2x128xf32>
    %195 = arith.mulf %194, %184 : vector<2x128xf32>
    %196 = arith.addf %179, %195 : vector<2x128xf32>
    %c10_i32 = arith.constant 10 : i32
    %197 = vector.broadcast %c10_i32 : i32 to vector<2x128xi32>
    %198 = arith.cmpi sge, %34, %197 : vector<2x128xi32>
    %c10_i32_88 = arith.constant 10 : i32
    %199 = tpu.dynamic_rotate %17 by %c10_i32_88 dim 1 : vector<2x128xf32>, i32 -> vector<2x128xf32>
    %cst_89 = arith.constant 0.000000e+00 : f32
    %200 = vector.broadcast %cst_89 : f32 to vector<2x128xf32>
    %201 = arith.select %198, %199, %200 : vector<2x128xi1>, vector<2x128xf32>
    %c0_90 = arith.constant 0 : index
    %c10 = arith.constant 10 : index
    %202 = memref.load %arg1[%c0_90, %c10] : memref<3x32xf32, #tpu.memory_space<smem>>
    %203 = vector.broadcast %202 : f32 to vector<2x128xf32>
    %204 = arith.mulf %203, %201 : vector<2x128xf32>
    %205 = arith.addf %188, %204 : vector<2x128xf32>
    %c1_91 = arith.constant 1 : index
    %c10_92 = arith.constant 10 : index
    %206 = memref.load %arg1[%c1_91, %c10_92] : memref<3x32xf32, #tpu.memory_space<smem>>
    %207 = vector.broadcast %206 : f32 to vector<2x128xf32>
    %208 = arith.mulf %207, %201 : vector<2x128xf32>
    %209 = arith.addf %192, %208 : vector<2x128xf32>
    %c2_93 = arith.constant 2 : index
    %c10_94 = arith.constant 10 : index
    %210 = memref.load %arg1[%c2_93, %c10_94] : memref<3x32xf32, #tpu.memory_space<smem>>
    %211 = vector.broadcast %210 : f32 to vector<2x128xf32>
    %212 = arith.mulf %211, %201 : vector<2x128xf32>
    %213 = arith.addf %196, %212 : vector<2x128xf32>
    %c11_i32 = arith.constant 11 : i32
    %214 = vector.broadcast %c11_i32 : i32 to vector<2x128xi32>
    %215 = arith.cmpi sge, %34, %214 : vector<2x128xi32>
    %c11_i32_95 = arith.constant 11 : i32
    %216 = tpu.dynamic_rotate %17 by %c11_i32_95 dim 1 : vector<2x128xf32>, i32 -> vector<2x128xf32>
    %cst_96 = arith.constant 0.000000e+00 : f32
    %217 = vector.broadcast %cst_96 : f32 to vector<2x128xf32>
    %218 = arith.select %215, %216, %217 : vector<2x128xi1>, vector<2x128xf32>
    %c0_97 = arith.constant 0 : index
    %c11 = arith.constant 11 : index
    %219 = memref.load %arg1[%c0_97, %c11] : memref<3x32xf32, #tpu.memory_space<smem>>
    %220 = vector.broadcast %219 : f32 to vector<2x128xf32>
    %221 = arith.mulf %220, %218 : vector<2x128xf32>
    %222 = arith.addf %205, %221 : vector<2x128xf32>
    %c1_98 = arith.constant 1 : index
    %c11_99 = arith.constant 11 : index
    %223 = memref.load %arg1[%c1_98, %c11_99] : memref<3x32xf32, #tpu.memory_space<smem>>
    %224 = vector.broadcast %223 : f32 to vector<2x128xf32>
    %225 = arith.mulf %224, %218 : vector<2x128xf32>
    %226 = arith.addf %209, %225 : vector<2x128xf32>
    %c2_100 = arith.constant 2 : index
    %c11_101 = arith.constant 11 : index
    %227 = memref.load %arg1[%c2_100, %c11_101] : memref<3x32xf32, #tpu.memory_space<smem>>
    %228 = vector.broadcast %227 : f32 to vector<2x128xf32>
    %229 = arith.mulf %228, %218 : vector<2x128xf32>
    %230 = arith.addf %213, %229 : vector<2x128xf32>
    %c12_i32 = arith.constant 12 : i32
    %231 = vector.broadcast %c12_i32 : i32 to vector<2x128xi32>
    %232 = arith.cmpi sge, %34, %231 : vector<2x128xi32>
    %c12_i32_102 = arith.constant 12 : i32
    %233 = tpu.dynamic_rotate %17 by %c12_i32_102 dim 1 : vector<2x128xf32>, i32 -> vector<2x128xf32>
    %cst_103 = arith.constant 0.000000e+00 : f32
    %234 = vector.broadcast %cst_103 : f32 to vector<2x128xf32>
    %235 = arith.select %232, %233, %234 : vector<2x128xi1>, vector<2x128xf32>
    %c0_104 = arith.constant 0 : index
    %c12 = arith.constant 12 : index
    %236 = memref.load %arg1[%c0_104, %c12] : memref<3x32xf32, #tpu.memory_space<smem>>
    %237 = vector.broadcast %236 : f32 to vector<2x128xf32>
    %238 = arith.mulf %237, %235 : vector<2x128xf32>
    %239 = arith.addf %222, %238 : vector<2x128xf32>
    %c1_105 = arith.constant 1 : index
    %c12_106 = arith.constant 12 : index
    %240 = memref.load %arg1[%c1_105, %c12_106] : memref<3x32xf32, #tpu.memory_space<smem>>
    %241 = vector.broadcast %240 : f32 to vector<2x128xf32>
    %242 = arith.mulf %241, %235 : vector<2x128xf32>
    %243 = arith.addf %226, %242 : vector<2x128xf32>
    %c2_107 = arith.constant 2 : index
    %c12_108 = arith.constant 12 : index
    %244 = memref.load %arg1[%c2_107, %c12_108] : memref<3x32xf32, #tpu.memory_space<smem>>
    %245 = vector.broadcast %244 : f32 to vector<2x128xf32>
    %246 = arith.mulf %245, %235 : vector<2x128xf32>
    %247 = arith.addf %230, %246 : vector<2x128xf32>
    %c13_i32 = arith.constant 13 : i32
    %248 = vector.broadcast %c13_i32 : i32 to vector<2x128xi32>
    %249 = arith.cmpi sge, %34, %248 : vector<2x128xi32>
    %c13_i32_109 = arith.constant 13 : i32
    %250 = tpu.dynamic_rotate %17 by %c13_i32_109 dim 1 : vector<2x128xf32>, i32 -> vector<2x128xf32>
    %cst_110 = arith.constant 0.000000e+00 : f32
    %251 = vector.broadcast %cst_110 : f32 to vector<2x128xf32>
    %252 = arith.select %249, %250, %251 : vector<2x128xi1>, vector<2x128xf32>
    %c0_111 = arith.constant 0 : index
    %c13 = arith.constant 13 : index
    %253 = memref.load %arg1[%c0_111, %c13] : memref<3x32xf32, #tpu.memory_space<smem>>
    %254 = vector.broadcast %253 : f32 to vector<2x128xf32>
    %255 = arith.mulf %254, %252 : vector<2x128xf32>
    %256 = arith.addf %239, %255 : vector<2x128xf32>
    %c1_112 = arith.constant 1 : index
    %c13_113 = arith.constant 13 : index
    %257 = memref.load %arg1[%c1_112, %c13_113] : memref<3x32xf32, #tpu.memory_space<smem>>
    %258 = vector.broadcast %257 : f32 to vector<2x128xf32>
    %259 = arith.mulf %258, %252 : vector<2x128xf32>
    %260 = arith.addf %243, %259 : vector<2x128xf32>
    %c2_114 = arith.constant 2 : index
    %c13_115 = arith.constant 13 : index
    %261 = memref.load %arg1[%c2_114, %c13_115] : memref<3x32xf32, #tpu.memory_space<smem>>
    %262 = vector.broadcast %261 : f32 to vector<2x128xf32>
    %263 = arith.mulf %262, %252 : vector<2x128xf32>
    %264 = arith.addf %247, %263 : vector<2x128xf32>
    %c14_i32 = arith.constant 14 : i32
    %265 = vector.broadcast %c14_i32 : i32 to vector<2x128xi32>
    %266 = arith.cmpi sge, %34, %265 : vector<2x128xi32>
    %c14_i32_116 = arith.constant 14 : i32
    %267 = tpu.dynamic_rotate %17 by %c14_i32_116 dim 1 : vector<2x128xf32>, i32 -> vector<2x128xf32>
    %cst_117 = arith.constant 0.000000e+00 : f32
    %268 = vector.broadcast %cst_117 : f32 to vector<2x128xf32>
    %269 = arith.select %266, %267, %268 : vector<2x128xi1>, vector<2x128xf32>
    %c0_118 = arith.constant 0 : index
    %c14 = arith.constant 14 : index
    %270 = memref.load %arg1[%c0_118, %c14] : memref<3x32xf32, #tpu.memory_space<smem>>
    %271 = vector.broadcast %270 : f32 to vector<2x128xf32>
    %272 = arith.mulf %271, %269 : vector<2x128xf32>
    %273 = arith.addf %256, %272 : vector<2x128xf32>
    %c1_119 = arith.constant 1 : index
    %c14_120 = arith.constant 14 : index
    %274 = memref.load %arg1[%c1_119, %c14_120] : memref<3x32xf32, #tpu.memory_space<smem>>
    %275 = vector.broadcast %274 : f32 to vector<2x128xf32>
    %276 = arith.mulf %275, %269 : vector<2x128xf32>
    %277 = arith.addf %260, %276 : vector<2x128xf32>
    %c2_121 = arith.constant 2 : index
    %c14_122 = arith.constant 14 : index
    %278 = memref.load %arg1[%c2_121, %c14_122] : memref<3x32xf32, #tpu.memory_space<smem>>
    %279 = vector.broadcast %278 : f32 to vector<2x128xf32>
    %280 = arith.mulf %279, %269 : vector<2x128xf32>
    %281 = arith.addf %264, %280 : vector<2x128xf32>
    %c15_i32 = arith.constant 15 : i32
    %282 = vector.broadcast %c15_i32 : i32 to vector<2x128xi32>
    %283 = arith.cmpi sge, %34, %282 : vector<2x128xi32>
    %c15_i32_123 = arith.constant 15 : i32
    %284 = tpu.dynamic_rotate %17 by %c15_i32_123 dim 1 : vector<2x128xf32>, i32 -> vector<2x128xf32>
    %cst_124 = arith.constant 0.000000e+00 : f32
    %285 = vector.broadcast %cst_124 : f32 to vector<2x128xf32>
    %286 = arith.select %283, %284, %285 : vector<2x128xi1>, vector<2x128xf32>
    %c0_125 = arith.constant 0 : index
    %c15 = arith.constant 15 : index
    %287 = memref.load %arg1[%c0_125, %c15] : memref<3x32xf32, #tpu.memory_space<smem>>
    %288 = vector.broadcast %287 : f32 to vector<2x128xf32>
    %289 = arith.mulf %288, %286 : vector<2x128xf32>
    %290 = arith.addf %273, %289 : vector<2x128xf32>
    %c1_126 = arith.constant 1 : index
    %c15_127 = arith.constant 15 : index
    %291 = memref.load %arg1[%c1_126, %c15_127] : memref<3x32xf32, #tpu.memory_space<smem>>
    %292 = vector.broadcast %291 : f32 to vector<2x128xf32>
    %293 = arith.mulf %292, %286 : vector<2x128xf32>
    %294 = arith.addf %277, %293 : vector<2x128xf32>
    %c2_128 = arith.constant 2 : index
    %c15_129 = arith.constant 15 : index
    %295 = memref.load %arg1[%c2_128, %c15_129] : memref<3x32xf32, #tpu.memory_space<smem>>
    %296 = vector.broadcast %295 : f32 to vector<2x128xf32>
    %297 = arith.mulf %296, %286 : vector<2x128xf32>
    %298 = arith.addf %281, %297 : vector<2x128xf32>
    %c0_130 = arith.constant 0 : index
    %c0_131 = arith.constant 0 : index
    %c0_132 = arith.constant 0 : index
    %299 = vector.load %arg6[%c0_130, %c0_131, %c0_132] : memref<3x2x128xf32, #tpu.memory_space<vmem>>, vector<1x2x128xf32>
    %300 = vector.shape_cast %299 : vector<1x2x128xf32> to vector<2x128xf32>
    %301 = vector.shape_cast %290 : vector<2x128xf32> to vector<1x2x128xf32>
    tpu.vector_store %arg6[%c0_130, %c0_131, %c0_132], %301 {strides = array<i32>} : memref<3x2x128xf32, #tpu.memory_space<vmem>>, vector<1x2x128xf32>,
    %c1_133 = arith.constant 1 : index
    %c0_134 = arith.constant 0 : index
    %c0_135 = arith.constant 0 : index
    %302 = vector.load %arg6[%c1_133, %c0_134, %c0_135] : memref<3x2x128xf32, #tpu.memory_space<vmem>>, vector<1x2x128xf32>
    %303 = vector.shape_cast %302 : vector<1x2x128xf32> to vector<2x128xf32>
    %304 = vector.shape_cast %294 : vector<2x128xf32> to vector<1x2x128xf32>
    tpu.vector_store %arg6[%c1_133, %c0_134, %c0_135], %304 {strides = array<i32>} : memref<3x2x128xf32, #tpu.memory_space<vmem>>, vector<1x2x128xf32>,
    %c2_136 = arith.constant 2 : index
    %c0_137 = arith.constant 0 : index
    %c0_138 = arith.constant 0 : index
    %305 = vector.load %arg6[%c2_136, %c0_137, %c0_138] : memref<3x2x128xf32, #tpu.memory_space<vmem>>, vector<1x2x128xf32>
    %306 = vector.shape_cast %305 : vector<1x2x128xf32> to vector<2x128xf32>
    %307 = vector.shape_cast %298 : vector<2x128xf32> to vector<1x2x128xf32>
    tpu.vector_store %arg6[%c2_136, %c0_137, %c0_138], %307 {strides = array<i32>} : memref<3x2x128xf32, #tpu.memory_space<vmem>>, vector<1x2x128xf32>,
    return
  }
  func.func @transform_0(%arg0: i32) -> (i32, i32) {
    %c0_i32 = arith.constant 0 : i32
    %c0_i32_0 = arith.constant 0 : i32
    %c0_i32_1 = arith.constant 0 : i32
    return %c0_i32, %c0_i32_0 : i32, i32
  }
  func.func @transform_1(%arg0: i32) -> (i32, i32) {
    %c0_i32 = arith.constant 0 : i32
    %c0_i32_0 = arith.constant 0 : i32
    %c0_i32_1 = arith.constant 0 : i32
    return %c0_i32, %c0_i32_0 : i32, i32
  }
  func.func @transform_2(%arg0: i32) -> (i32, i32, i32) {
    %c0_i32 = arith.constant 0 : i32
    %c0_i32_0 = arith.constant 0 : i32
    %c0_i32_1 = arith.constant 0 : i32
    return %arg0, %c0_i32, %c0_i32_0 : i32, i32, i32
  }
  func.func @transform_3(%arg0: i32) -> (i32, i32) {
    %c0_i32 = arith.constant 0 : i32
    %c0_i32_0 = arith.constant 0 : i32
    return %arg0, %c0_i32 : i32, i32
  }
  func.func @transform_4(%arg0: i32) -> (i32, i32, i32) {
    %c0_i32 = arith.constant 0 : i32
    %c0_i32_0 = arith.constant 0 : i32
    %c0_i32_1 = arith.constant 0 : i32
    return %arg0, %c0_i32, %c0_i32_0 : i32, i32, i32
  }
  func.func @transform_5(%arg0: i32) -> (i32, i32, i32) {
    %c0_i32 = arith.constant 0 : i32
    %c0_i32_0 = arith.constant 0 : i32
    %c0_i32_1 = arith.constant 0 : i32
    return %c0_i32, %arg0, %c0_i32_0 : i32, i32, i32
  }
}

</mosaic_0001>

<bundles_post_ra>
// kernel: tpu_custom_call.1
= control target key start
LH: loop header
LB: loop body
LE: loop exit
PB: predicated region body
PF: predicated region fallthrough
CT: control target
= control target key end

     0   :  { %11 = vsyncpa [#allocation5], 0  ;;  %s893_s0 = inlined_call_operand.hbm [shape: f32[3,32], index: 0, kind: input, shape index: {}]   ;;  %s894_s1 = inlined_call_operand.hbm [shape: f32[3,32], index: 1, kind: input, shape index: {}]   ;;  %s895_s2 = inlined_call_operand.hbm [shape: f32[2,32,128], index: 2, kind: input, shape index: {}]   ;;  %s896_s3 = inlined_call_operand.vmem [shape: f32[2,128], index: 3, kind: input, shape index: {}]   ;;  %s897_s4 = inlined_call_operand.vmem [shape: f32[2,3,128], index: 4, kind: output, shape index: {0}]   ;;  %s898_s5 = inlined_call_operand.hbm [shape: f32[3,2,128], index: 5, kind: output, shape index: {1}]  }
   0x1   :  { %12 = vsyncpa [#allocation3], 0 }
   0x2   :  { %13 = vsyncpa [#allocation8], 0 }
   0x3   :  { %14 = vsyncpa [#allocation4], 0  ;;  %s20_s20 = sshll.u32 %s893_s0, 4  ;;  %s29_s23 = sshll.u32 %s894_s1, 4  ;;  %s21_s20 = int_to_ptr.hbm [resolvable:$true] %s20_s20  ;;  %s30_s23 = int_to_ptr.hbm [resolvable:$true] %s29_s23 }
   0x4   :  { %s577_s24 = smov [#allocation2]   ;;  %s578_s25 = smov [#allocation6]  }
   0x5   :  { %23 = dma.hbm_to_smem %s21_s20, 64, %s577_s24, [#allocation5]  }
   0x6   :  { %s31_s26 = sshll.u32 %s578_s25, 4  ;;  %s39_s29 = sshll.u32 %s895_s2, 4  ;;  %s32_s26 = int_to_ptr.vmem [resolvable:$true] %s31_s26  ;;  %s40_s29 = int_to_ptr.hbm [resolvable:$true] %s39_s29 }
   0x7   :  { %34 = dma.hbm_to_vmem [thread:$0]  %s30_s23, 64, %s32_s26, [#allocation3]  }
   0x8   :  { %s579_s30 = smov [#allocation7]   ;;  %s580_s0 = smov 128  }
   0x9   :  { %s41_s6 = sshll.u32 %s579_s30, 4  ;;  %s581_s7 = smov 8   ;;  %s42_s6 = int_to_ptr.vmem [resolvable:$true] %s41_s6 }
   0xa   :  { %47 = dma.hbm_to_vmem [thread:$0]  %s40_s29, 1024, %s42_s6, [#allocation8], %s580_s0, %s580_s0, %s581_s7  }
   0xb   :  { %569 = dma.done.wait [#allocation5], 64  }
   0xc   :  { %570 = vsyncadd [#allocation5], 4294967232 }
   0xd   :  { %571 = dma.done.wait [#allocation3], 64  }
   0xe   :  { %572 = vsyncadd [#allocation3], 4294967232 }
   0xf   :  { %573 = dma.done.wait [#allocation8], 1024  }
  0x10   :  { %574 = vsyncadd [#allocation8], 4294966272 }
  0x11   :  { %62 = sfence }
  0x12   :  { %v641_v0 = vld [vmem:[%s896_s3] sm:$0x3]  ;;  %s582_s2 = smov 1   ;;  %s583_s9 = smov 3   ;;  %v66_v3 = vld [vmem:[#allocation7 + $0x10] sm:$0xff]  ;;  %v65_v5 = vld [vmem:[#allocation7 + $0x8] sm:$0xff]  ;;  %v121_v10 = vlaneseq }
  0x13   :  { %v67_v1 = vld [vmem:[#allocation7 + $0x18] sm:$0xff]  ;;  %145 = vrot.lane.b32.xlu0 %v641_v0, %s582_s2  ;;  %177 = vrot.lane.b32.xlu1 %v641_v0, %s583_s9  ;;  %v96_v4 = vld [vmem:[#allocation7 + $0x30] sm:$0xff]  ;;  %v95_v6 = vld [vmem:[#allocation7 + $0x28] sm:$0xff]  ;;  %s584_s10 = smov 5   ;;  %vm68_vm0 = vcmask 261120   ;;  %s585_s3 = smov 2  }
  0x14   :  { %v97_v2 = vld [vmem:[#allocation7 + $0x38] sm:$0xff]  ;;  %84 = vmatpush.msra.mxu0 %v67_v1  ;;  %209 = vrot.lane.b32.xlu2 %v641_v0, %s584_s10  ;;  %v64_v7 = vld [vmem:[#allocation7] sm:$0xff]  ;;  %s586_s11 = smov 4   ;;  %s587_s12 = smov 6   ;;  %v122_v11 = vand.u32 127, %v121_v10 }
  0x15   :  { %110 = vmatpush.msra.mxu1 %v97_v2  ;;  %v94_v8 = vld [vmem:[#allocation7 + $0x20] sm:$0xff]  ;;  %v63_v9 = vld [vmem:[#allocation6] sm:$0x7]  ;;  %s588_s13 = smov 7   ;;  %s589_s14 = smov 9  }
  0x16   :  { %85 = vmatpush.msra.mxu0 %v66_v3  ;;  %s590_s15 = smov 10   ;;  %s591_s16 = smov 11   ;;  %v700_v13 = vand.u32 15, %v122_v11 }
  0x17   :  { %111 = vmatpush.msra.mxu1 %v96_v4  ;;  %s592_s17 = smov 12   ;;  %s593_s18 = smov 13  }
  0x18   :  { %86 = vmatpush.msra.mxu0 %v65_v5  ;;  %s594_s19 = smov 14   ;;  %s595_s20 = smov 15   ;;  %vm144_vm1 = vcmp.ge.s32.totalorder %v700_v13, 1  ;;  %vm208_vm2 = vcmp.ge.s32.totalorder %v700_v13, 5  ;;  %vm176_vm3 = vcmp.ge.s32.totalorder %v700_v13, 3  ;;  %vm160_vm4 = vcmp.ge.s32.totalorder %v700_v13, 2 }
  0x19   :  { %112 = vmatpush.msra.mxu1 %v95_v6  ;;  %s660_s21 = sld [smem:[#allocation2]]  ;;  %vm192_vm5 = vcmp.ge.s32.totalorder %v700_v13, 4  ;;  %vm224_vm6 = vcmp.ge.s32.totalorder %v700_v13, 6  ;;  %vm240_vm7 = vcmp.ge.s32.totalorder %v700_v13, 7  ;;  %vm256_vm8 = vcmp.ge.s32.totalorder %v700_v13, 8 }
  0x1a   :  { %87 = vmatpush.msra.mxu0 %v64_v7  ;;  %s662_s22 = sld [smem:[#allocation2 + $0x80]]  ;;  %vm272_vm9 = vcmp.ge.s32.totalorder %v700_v13, 9  ;;  %vm288_vm10 = vcmp.ge.s32.totalorder %v700_v13, 10  ;;  %vm304_vm11 = vcmp.ge.s32.totalorder %v700_v13, 11  ;;  %vm320_vm12 = vcmp.ge.s32.totalorder %v700_v13, 12 }
  0x1b   :  { %113 = vmatpush.msra.mxu1 %v94_v8  ;;  %161 = vrot.lane.b32.xlu0 %v641_v0, %s585_s3  ;;  %s664_s23 = sld [smem:[#allocation2 + $0x100]]  ;;  %vm336_vm13 = vcmp.ge.s32.totalorder %v700_v13, 13  ;;  %vm368_vm14 = vcmp.ge.s32.totalorder %v700_v13, 15  ;;  %vm352_vm15 = vcmp.ge.s32.totalorder %v700_v13, 14 }
  0x1c   :  { %193 = vrot.lane.b32.xlu1 %v641_v0, %s586_s11  ;;  %414 = vmatmul.msk.f32.vlgmr.msra.gmra.mxu0 %vm68_vm0, %v63_v9  ;;  %s666_s24 = sld [smem:[#allocation2 + $0x1]] }
  0x1d   :  { %415 = vmatmul.msk.f32.vlgmr.msra.gmra.mxu1 %vm68_vm0, %v63_v9  ;;  %225 = vrot.lane.b32.xlu2 %v641_v0, %s587_s12  ;;  %s668_s25 = sld [smem:[#allocation2 + $0x81]] }
  0x1e   :  { %s670_s26 = sld [smem:[#allocation2 + $0x101]] }
  0x1f   :  { %s672_s27 = sld [smem:[#allocation2 + $0x3]]  ;;  %v136_v14 = vstv %s660_s21 }
  0x20   :  { %s674_s28 = sld [smem:[#allocation2 + $0x83]]  ;;  %v139_v15 = vstv %s662_s22  ;;  %v137_v20 = vmul.f32 %v136_v14, %v641_v0 }
  0x21   :  { %s676_s29 = sld [smem:[#allocation2 + $0x103]]  ;;  %v142_v16 = vstv %s664_s23  ;;  %v140_v21 = vmul.f32 %v139_v15, %v641_v0 }
  0x22   :  { %s678_s30 = sld [smem:[#allocation2 + $0x5]]  ;;  %v149_v17 = vstv %s666_s24  ;;  %v143_v22 = vmul.f32 %v142_v16, %v641_v0 }
  0x23   :  { %241 = vrot.lane.b32.xlu0 %v641_v0, %s588_s13  ;;  %s680_s6 = sld [smem:[#allocation2 + $0x85]]  ;;  %v153_v18 = vstv %s668_s25 }
  0x24   :  { %257 = vrot.lane.b32.xlu1 %v641_v0, %s581_s7  ;;  %s682_s0 = sld [smem:[#allocation2 + $0x105]]  ;;  %v157_v19 = vstv %s670_s26 }
  0x25   :  { %273 = vrot.lane.b32.xlu2 %v641_v0, %s589_s14  ;;  %s684_s7 = sld [smem:[#allocation2 + $0x2]]  ;;  %v181_v23 = vstv %s672_s27 }
  0x26   :  { %s686_s1 = sld [smem:[#allocation2 + $0x82]]  ;;  %v185_v24 = vstv %s674_s28 }
  0x27   :  { %s688_s8 = sld [smem:[#allocation2 + $0x102]]  ;;  %v189_v25 = vstv %s676_s29 }
  0x28   :  { %s690_s2 = sld [smem:[#allocation2 + $0x4]]  ;;  %v213_v29 = vstv %s678_s30 }
  0x29   :  { %s692_s9 = sld [smem:[#allocation2 + $0x84]]  ;;  %v217_v30 = vstv %s680_s6 }
  0x2a   :  { %s694_s10 = sld [smem:[#allocation2 + $0x104]]  ;;  %v221_v31 = vstv %s682_s0 }
  0x2b   :  { %289 = vrot.lane.b32.xlu0 %v641_v0, %s590_s15  ;;  %s696_s11 = sld [smem:[#allocation2 + $0x6]]  ;;  %v165_v33 = vstv %s684_s7 }
  0x2c   :  { %305 = vrot.lane.b32.xlu1 %v641_v0, %s591_s16  ;;  %s698_s12 = sld [smem:[#allocation2 + $0x86]]  ;;  %v169_v34 = vstv %s686_s1 }
  0x2d   :  { %321 = vrot.lane.b32.xlu2 %v641_v0, %s592_s17  ;;  %s702_s13 = sld [smem:[#allocation2 + $0x106]]  ;;  %v173_v35 = vstv %s688_s8 }
  0x2e   :  { %s704_s14 = sld [smem:[#allocation2 + $0x7]]  ;;  %v197_v37 = vstv %s690_s2 }
  0x2f   :  { %s709_s15 = sld [smem:[#allocation2 + $0x87]]  ;;  %v201_v38 = vstv %s692_s9 }
  0x30   :  { %s711_s16 = sld [smem:[#allocation2 + $0x107]]  ;;  %v205_v39 = vstv %s694_s10 }
  0x31   :  { %s717_s17 = sld [smem:[#allocation2 + $0x8]]  ;;  %v229_v40 = vstv %s696_s11 }
  0x32   :  { %s745_s21 = sld [smem:[#allocation2 + $0x89]]  ;;  %v233_v41 = vstv %s698_s12 }
  0x33   :  { %337 = vrot.lane.b32.xlu0 %v641_v0, %s593_s18  ;;  %s723_s18 = sld [smem:[#allocation2 + $0x88]]  ;;  %v237_v45 = vstv %s702_s13 }
  0x34   :  { %353 = vrot.lane.b32.xlu1 %v641_v0, %s594_s19  ;;  %s729_s19 = sld [smem:[#allocation2 + $0x108]]  ;;  %v245_v50 = vstv %s704_s14 }
  0x35   :  { %369 = vrot.lane.b32.xlu2 %v641_v0, %s595_s20  ;;  %s738_s20 = sld [smem:[#allocation2 + $0x9]]  ;;  %v249_v51 = vstv %s709_s15 }
  0x36   :  { %s751_s22 = sld [smem:[#allocation2 + $0x109]]  ;;  %v253_v52 = vstv %s711_s16 }
  0x37   :  { %s760_s23 = sld [smem:[#allocation2 + $0xa]]  ;;  %v261_v53 = vstv %s717_s17 }
  0x38   :  { %s762_s24 = sld [smem:[#allocation2 + $0x8a]]  ;;  %v281_v10 = vstv %s745_s21  ;;  %s597_s21 = smov 32  }
  0x39   :  { %s768_s25 = sld [smem:[#allocation2 + $0x10a]]  ;;  %v265_v54 = vstv %s723_s18 }
  0x3a   :  { %v269_v55 = vstv %s729_s19  ;;  %s775_s26 = sld [smem:[#allocation2 + $0xb]] }
  0x3b   :  { %s779_s30 = sld [smem:[#allocation2 + $0x8b]]  ;;  %v277_v9 = vstv %s738_s20  ;;  %s397_s20 = sshll.u32 %s898_s5, 4  ;;  %s398_s20 = int_to_ptr.hbm [resolvable:$true] %s397_s20 }
  0x3c   :  { %s783_s6 = sld [smem:[#allocation2 + $0x10b]] }
  0x3d   :  { %s795_s0 = sld [smem:[#allocation2 + $0xc]] }
  0x3e   :  { %s799_s27 = sld [smem:[#allocation2 + $0x8c]] }
  0x3f   :  { %s802_s28 = sld [smem:[#allocation2 + $0x10c]] }
  0x40   :  { %s808_s29 = sld [smem:[#allocation2 + $0xd]] }
  0x41   :  { %s812_s7 = sld [smem:[#allocation2 + $0x8d]] }
  0x42   :  { %s819_s1 = sld [smem:[#allocation2 + $0x10d]] }
  0x43   :  { %s830_s8 = sld [smem:[#allocation2 + $0xe]] }
  0x44   :  { %s834_s2 = sld [smem:[#allocation2 + $0x8e]] }
  0x45   :  { %s841_s9 = sld [smem:[#allocation2 + $0x10e]] }
  0x46   :  { %s848_s12 = sld [smem:[#allocation2 + $0xf]] }
  0x47   :  { %s857_s15 = sld [smem:[#allocation2 + $0x8f]] }
  0x48   :  { %s860_s16 = sld [smem:[#allocation2 + $0x10f]] }
  0x6e   :  { %v210_v12 = vpop.permute.xlu2 %209 }
  0x6f   :  { %v211_v32 = vsel %vm208_vm2, %v210_v12, 0.0 }
  0x70   :  { %v753_v42 = vmul.f32 %v213_v29, %v211_v32  ;;  %v755_v43 = vmul.f32 %v217_v30, %v211_v32  ;;  %v757_v44 = vmul.f32 %v221_v31, %v211_v32 }
  0x77   :  { %v226_v26 = vpop.permute.xlu2 %225 }
  0x78   :  { %v227_v49 = vsel %vm224_vm6, %v226_v26, 0.0  ;;  %v309_v26 = vstv %s775_s26 }
  0x79   :  { %v230_v59 = vmul.f32 %v229_v40, %v227_v49  ;;  %v234_v60 = vmul.f32 %v233_v41, %v227_v49  ;;  %v238_v61 = vmul.f32 %v237_v45, %v227_v49 }
  0x7f   :  { %v274_v2 = vpop.permute.xlu2 %273 }
  0x80   :  { %v275_v32 = vsel %vm272_vm9, %v274_v2, 0.0 }
  0x81   :  { %v278_v45 = vmul.f32 %v277_v9, %v275_v32 }
  0x85   :  { %v146_v27 = vpop.permute.xlu0 %145  ;;  %v178_v28 = vpop.permute.xlu1 %177 }
  0x86   :  { %v147_v36 = vsel %vm144_vm1, %v146_v27, 0.0  ;;  %v179_v56 = vsel %vm176_vm3, %v178_v28, 0.0 }
  0x87   :  { %v150_v46 = vmul.f32 %v149_v17, %v147_v36  ;;  %v154_v47 = vmul.f32 %v153_v18, %v147_v36  ;;  %v158_v48 = vmul.f32 %v157_v19, %v147_v36  ;;  %v182_v7 = vmul.f32 %v181_v23, %v179_v56 }
  0x88   :  { %v186_v8 = vmul.f32 %v185_v24, %v179_v56  ;;  %v190_v11 = vmul.f32 %v189_v25, %v179_v56  ;;  %v285_v18 = vstv %s751_s22  ;;  %v293_v19 = vstv %s760_s23 }
  0x89   :  { %v151_v62 = vadd.f32 %v150_v46, %v137_v20  ;;  %v155_v63 = vadd.f32 %v154_v47, %v140_v21  ;;  %v159_v0 = vadd.f32 %v158_v48, %v143_v22  ;;  %v297_v24 = vstv %s762_s24  ;;  %v322_v47 = vpop.permute.xlu2 %321 }
  0x8a   :  { %v301_v25 = vstv %s768_s25  ;;  %v282_v46 = vmul.f32 %v281_v10, %v275_v32 }
  0x8d   :  { %v162_v57 = vpop.permute.xlu0 %161 }
  0x8e   :  { %v194_v58 = vpop.permute.xlu1 %193  ;;  %v163_v1 = vsel %vm160_vm4, %v162_v57, 0.0  ;;  %v286_v57 = vmul.f32 %v285_v18, %v275_v32 }
  0x8f   :  { %v166_v3 = vmul.f32 %v165_v33, %v163_v1  ;;  %v170_v4 = vmul.f32 %v169_v34, %v163_v1  ;;  %v174_v5 = vmul.f32 %v173_v35, %v163_v1  ;;  %v195_v6 = vsel %vm192_vm5, %v194_v58, 0.0 }
  0x90   :  { %v198_v16 = vmul.f32 %v197_v37, %v195_v6  ;;  %v202_v17 = vmul.f32 %v201_v38, %v195_v6  ;;  %v206_v23 = vmul.f32 %v205_v39, %v195_v6  ;;  %v313_v34 = vstv %s779_s30 }
  0x91   :  { %v167_v12 = vadd.f32 %v166_v3, %v151_v62  ;;  %v171_v14 = vadd.f32 %v170_v4, %v155_v63  ;;  %v175_v15 = vadd.f32 %v174_v5, %v159_v0  ;;  %v317_v35 = vstv %s783_s6 }
  0x92   :  { %v325_v58 = vstv %s795_s0  ;;  %v341_v62 = vstv %s808_s29  ;;  %v345_v3 = vstv %s812_s7  ;;  %v323_v6 = vsel %vm320_vm12, %v322_v47, 0.0 }
  0x93   :  { %v183_v20 = vadd.f32 %v182_v7, %v167_v12  ;;  %v187_v21 = vadd.f32 %v186_v8, %v171_v14  ;;  %v191_v22 = vadd.f32 %v190_v11, %v175_v15  ;;  %v349_v7 = vstv %s819_s1 }
  0x95   :  { %v199_v27 = vadd.f32 %v198_v16, %v183_v20  ;;  %v203_v28 = vadd.f32 %v202_v17, %v187_v21  ;;  %v207_v29 = vadd.f32 %v206_v23, %v191_v22  ;;  %v242_v30 = vpop.permute.xlu0 %241  ;;  %v326_v20 = vmul.f32 %v325_v58, %v323_v6 }
  0x96   :  { %v258_v31 = vpop.permute.xlu1 %257  ;;  %v243_v33 = vsel %vm240_vm7, %v242_v30, 0.0  ;;  %v365_v30 = vstv %s841_s9 }
  0x97   :  { %v215_v36 = vadd.f32 %v753_v42, %v199_v27  ;;  %v219_v37 = vadd.f32 %v755_v43, %v203_v28  ;;  %v223_v38 = vadd.f32 %v757_v44, %v207_v29  ;;  %v259_v39 = vsel %vm256_vm8, %v258_v31, 0.0 }
  0x98   :  { %v246_v40 = vmul.f32 %v245_v50, %v243_v33  ;;  %v250_v41 = vmul.f32 %v249_v51, %v243_v33  ;;  %v254_v44 = vmul.f32 %v253_v52, %v243_v33  ;;  %v262_v51 = vmul.f32 %v261_v53, %v259_v39 }
  0x99   :  { %v231_v42 = vadd.f32 %v230_v59, %v215_v36  ;;  %v235_v43 = vadd.f32 %v234_v60, %v219_v37  ;;  %v239_v48 = vadd.f32 %v238_v61, %v223_v38  ;;  %v89_v49 = vpop.f32.mrf.mxu0  ;;  %v266_v56 = vmul.f32 %v265_v54, %v259_v39 }
  0x9a   :  { %v115_v50 = vpop.f32.mrf.mxu1  ;;  %92 = vst [vmem:[%s897_s4] sm:$0x7] %v89_v49  ;;  %v270_v61 = vmul.f32 %v269_v55, %v259_v39  ;;  %v329_v53 = vstv %s799_s27  ;;  %v333_v54 = vstv %s802_s28  ;;  %v373_v31 = vstv %s848_s12 }
  0x9b   :  { %v247_v52 = vadd.f32 %v246_v40, %v231_v42  ;;  %v251_v59 = vadd.f32 %v250_v41, %v235_v43  ;;  %v255_v60 = vadd.f32 %v254_v44, %v239_v48  ;;  %416 = vst [vmem:[%s897_s4 + $0x4] sm:$0x7] %v115_v50  ;;  %v330_v21 = vmul.f32 %v329_v53, %v323_v6  ;;  %s596_s4 = smov [#allocation9]  }
  0x9c   :  { %v381_v36 = vstv %s860_s16  ;;  %s395_s17 = sshll.u32 %s596_s4, 4  ;;  %s396_s17 = int_to_ptr.vmem [resolvable:$true] %s395_s17 }
  0x9d   :  { %v263_v63 = vadd.f32 %v262_v51, %v247_v52  ;;  %v267_v0 = vadd.f32 %v266_v56, %v251_v59  ;;  %v271_v55 = vadd.f32 %v270_v61, %v255_v60  ;;  %v290_v1 = vpop.permute.xlu0 %289 }
  0x9e   :  { %v306_v2 = vpop.permute.xlu1 %305  ;;  %v291_v4 = vsel %vm288_vm10, %v290_v1, 0.0 }
  0x9f   :  { %v307_v5 = vsel %vm304_vm11, %v306_v2, 0.0  ;;  %v279_v8 = vadd.f32 %v278_v45, %v263_v63  ;;  %v283_v9 = vadd.f32 %v282_v46, %v267_v0  ;;  %v287_v10 = vadd.f32 %v286_v57, %v271_v55 }
  0xa0   :  { %v294_v11 = vmul.f32 %v293_v19, %v291_v4  ;;  %v298_v12 = vmul.f32 %v297_v24, %v291_v4  ;;  %v302_v14 = vmul.f32 %v301_v25, %v291_v4  ;;  %v310_v15 = vmul.f32 %v309_v26, %v307_v5  ;;  %v370_v24 = vpop.permute.xlu2 %369 }
  0xa1   :  { %v314_v16 = vmul.f32 %v313_v34, %v307_v5  ;;  %v318_v18 = vmul.f32 %v317_v35, %v307_v5  ;;  %v334_v19 = vmul.f32 %v333_v54, %v323_v6  ;;  %v357_v25 = vstv %s830_s8 }
  0xa2   :  { %v295_v17 = vadd.f32 %v294_v11, %v279_v8  ;;  %v299_v22 = vadd.f32 %v298_v12, %v283_v9  ;;  %v303_v23 = vadd.f32 %v302_v14, %v287_v10  ;;  %v361_v26 = vstv %s834_s2 }
  0xa3   :  { %v377_v35 = vstv %s857_s15  ;;  %v371_v37 = vsel %vm368_vm14, %v370_v24, 0.0 }
  0xa4   :  { %v311_v27 = vadd.f32 %v310_v15, %v295_v17  ;;  %v315_v28 = vadd.f32 %v314_v16, %v299_v22  ;;  %v319_v29 = vadd.f32 %v318_v18, %v303_v23  ;;  %v374_v44 = vmul.f32 %v373_v31, %v371_v37 }
  0xa5   :  { %v338_v33 = vpop.permute.xlu0 %337  ;;  %v378_v49 = vmul.f32 %v377_v35, %v371_v37  ;;  %v382_v57 = vmul.f32 %v381_v36, %v371_v37 }
  0xa6   :  { %v327_v32 = vadd.f32 %v326_v20, %v311_v27  ;;  %v354_v34 = vpop.permute.xlu1 %353  ;;  %v331_v38 = vadd.f32 %v330_v21, %v315_v28  ;;  %v335_v39 = vadd.f32 %v334_v19, %v319_v29  ;;  %v339_v40 = vsel %vm336_vm13, %v338_v33, 0.0 }
  0xa7   :  { %v355_v41 = vsel %vm352_vm15, %v354_v34, 0.0  ;;  %v342_v45 = vmul.f32 %v341_v62, %v339_v40  ;;  %v346_v46 = vmul.f32 %v345_v3, %v339_v40  ;;  %v350_v47 = vmul.f32 %v349_v7, %v339_v40 }
  0xa8   :  { %v358_v42 = vmul.f32 %v357_v25, %v355_v41  ;;  %v362_v43 = vmul.f32 %v361_v26, %v355_v41  ;;  %v366_v48 = vmul.f32 %v365_v30, %v355_v41 }
  0xa9   :  { %v343_v50 = vadd.f32 %v342_v45, %v327_v32  ;;  %v347_v51 = vadd.f32 %v346_v46, %v331_v38  ;;  %v351_v56 = vadd.f32 %v350_v47, %v335_v39 }
  0xab   :  { %v359_v58 = vadd.f32 %v358_v42, %v343_v50  ;;  %v363_v52 = vadd.f32 %v362_v43, %v347_v51  ;;  %v367_v59 = vadd.f32 %v366_v48, %v351_v56 }
  0xad   :  { %v375_v13 = vadd.f32 %v374_v44, %v359_v58  ;;  %v379_v60 = vadd.f32 %v378_v49, %v363_v52  ;;  %v383_v61 = vadd.f32 %v382_v57, %v367_v59 }
  0xaf   :  { %384 = vst [vmem:[#allocation9] sm:$0x3] %v375_v13 }
  0xb0   :  { %386 = vst [vmem:[#allocation9 + $0x2] sm:$0x3] %v379_v60 }
  0xb1   :  { %388 = vst [vmem:[#allocation9 + $0x4] sm:$0x3] %v383_v61 }
  0xb2   :  { %403 = dma.vmem_to_hbm [thread:$0]  %s396_s17, 96, %s398_s20, [#allocation4], %s597_s21, %s597_s21, %s585_s3  }
  0xb3   :  { %575 = dma.done.wait [#allocation4], 96  }
  0xb4   :  { %576 = vsyncadd [#allocation4], 4294967200 }
  0xb5   :  { %410 = vsyncpa [#allocation3], 1 }
  0xb6   :  { %411 = vsyncpa [#allocation8], 1 }
  0xb7   :  { %412 = vsyncpa [#allocation4], 1 }
  0xb8   :  { %413 = vsyncpa [#allocation5], 1 }

</bundles_post_ra>
